<compile_context>
chip_gen: v5e
topology: v5e:2x2
jax: 0.10.0
libtpu: 0.0.40
codegen_flags: <defaults>
</compile_context>

<pallas_src>
import jax
import jax.numpy as jnp
from jax.experimental import pallas as pl
from jax.experimental.pallas import tpu as pltpu

# ---- model hyper-params (consistent with the PyTorch module) ----
VOCAB = 50
VOCAB_PAD = 64      # vocab padded so sentinel rows exist and lanes tile nicely
SENTINEL = VOCAB    # maps to a zero row -> conv zero padding
EMB = 32            # embedding_dim
CONV_OUT = 32       # conv1d out_channels
HID = 32            # lstm hidden_dim
OUT = 3             # output_dim
K = 3               # conv kernel size (padding=1)
B = 2               # batch
L = 8               # sequence length (<= max_len)
T = L // 2          # sequence length after MaxPool1d(2)
LANES = 128         # = 4*HID, lane-dense width

# conv-output row order: even sequence positions first, then odd, so MaxPool1d(2) is
# max(rows 0:T*B, rows T*B:2*T*B) and the pooled result is directly time-major.
POS_ORDER = (0, 2, 4, 6, 1, 3, 5, 7)


def lstm_sentiment_kernel(idx_ref, gtab_ref, wslab_ref, out_ref):
    # ---- packed weights: static, 8/128-aligned slices of one slab ----
    w_ih_cat = wslab_ref[0:32, :]              # (32, 256)  [forward | backward] input proj
    w_hh_f   = wslab_ref[32:64, 0:LANES]       # (32, 128)
    w_fc     = wslab_ref[64:128, 0:LANES]      # (64, 128)  lane-padded OUT -> 128
    bias     = wslab_ref[128:136, 0:LANES]     # (8, 128)   bias block
    b_f  = bias[0:1, :]
    b_b  = bias[1:2, :]
    b_fc = bias[2:3, :]
    b_cv = bias[3:4, 0:CONV_OUT]

    # ---- fused embedding gather + conv padding + im2col + Conv1d: one matmul ----
    # onehot[r, k*64 + v] = 1 iff tap k of conv-output row r reads (padded) vocab row v;
    # gtab[k*64 + v] = emb_pad[v] @ W_conv_tap_k, so onehot @ gtab == Conv1d output rows.
    idx = idx_ref[...]                                                     # (L*B, K) int32
    iota = jax.lax.broadcasted_iota(jnp.int32, (L * B, K * VOCAB_PAD), 1)
    onehot = ((iota == idx[:, 0:1]) | (iota == idx[:, 1:2]) | (iota == idx[:, 2:3]))
    conv = jnp.dot(onehot.astype(jnp.float32), gtab_ref[...],
                   preferred_element_type=jnp.float32) + b_cv              # (L*B, CONV_OUT)

    # ---- MaxPool1d(2): rows are even-pos-first, so one aligned max; result is time-major ----
    feats = jnp.maximum(conv[0:T * B, :], conv[T * B:2 * T * B, :])        # (T*B, CONV_OUT)

    # ---- both directions' input projections in a single matmul (hoisted out of recurrence) ----
    xall = jnp.dot(feats, w_ih_cat, preferred_element_type=jnp.float32)    # (T*B, 256)
    xf = xall[:, 0:4 * HID] + b_f                                          # (T*B, 128)
    xb = xall[(T - 1) * B:T * B, 4 * HID:8 * HID] + b_b                    # (B, 128)

    def gates(g):
        # one sigmoid + one tanh over the full 128-lane gate vector, then lane-slice
        sg = jax.nn.sigmoid(g)
        tg = jnp.tanh(g)
        return (sg[:, 0 * HID:1 * HID], sg[:, 1 * HID:2 * HID],
                tg[:, 2 * HID:3 * HID], sg[:, 3 * HID:4 * HID])

    # ---- forward LSTM; step 0 has h=c=0, so no h@w_hh matmul and no f*c term ----
    i0, _, g0, o0 = gates(xf[0:B, :])
    c = i0 * g0
    h = o0 * jnp.tanh(c)
    for t in range(1, T):
        g = xf[t * B:(t + 1) * B, :] + jnp.dot(h, w_hh_f,
                                               preferred_element_type=jnp.float32)
        i, f, gg, o = gates(g)
        c = f * c + i * gg
        h = o * jnp.tanh(c)

    # ---- backward LSTM: output[:, -1, HID:] is the reverse direction's FIRST step from zero
    #      state, so a single step suffices and w_hh_b is never needed (valid only because the
    #      model consumes output[:, -1, :] exclusively). ----
    ib, _, gb, ob = gates(xb)
    hb = ob * jnp.tanh(ib * gb)

    # ---- Dropout is identity in eval mode; fused Linear(2H -> OUT), lane-dense store ----
    hcat = jnp.concatenate([h, hb], axis=-1)                               # (B, 2H)
    out_ref[...] = (jnp.dot(hcat, w_fc, preferred_element_type=jnp.float32) + b_fc)


def lstm_sentiment_forward(tokens, packed):
    # tiny per-call int preprocessing: per-(conv-row, tap) table indices, sentinel = conv padding
    tokpad = jnp.pad(tokens.astype(jnp.int32), ((0, 0), (1, 1)),
                     constant_values=SENTINEL)                             # (B, L+2)
    pos = jnp.asarray(POS_ORDER, jnp.int32)                                # (L,)
    win = pos[:, None] + jnp.arange(K, dtype=jnp.int32)[None, :]           # (L, K) padded positions
    toks = jnp.transpose(tokpad[:, win], (1, 0, 2)).reshape(L * B, K)      # row = pos_idx*B + b
    idx = toks + jnp.arange(K, dtype=jnp.int32)[None, :] * VOCAB_PAD       # (L*B, K)

    vmem = pl.BlockSpec(memory_space=pltpu.MemorySpace.VMEM)
    out = pl.pallas_call(
        lstm_sentiment_kernel,
        out_shape=jax.ShapeDtypeStruct((B, LANES), jnp.float32),
        in_specs=[vmem, vmem, vmem],
        out_specs=vmem,
    )(idx, packed["gtab"], packed["wslab"])
    return out[:, :OUT]


def init_params(key):
    """Torch-layout parameters for LSTMSentimentModel (random, deterministic)."""
    ks = jax.random.split(key, 13)
    s = 0.1
    embedding = (jax.random.normal(ks[0], (VOCAB, EMB), jnp.float32) * s).at[0].set(0.0)
    w_conv = jax.random.normal(ks[1], (CONV_OUT, EMB, K), jnp.float32) * s     # torch Conv1d weight
    b_conv = jax.random.normal(ks[2], (CONV_OUT,), jnp.float32) * s
    w_ih_f = jax.random.normal(ks[3], (4 * HID, CONV_OUT), jnp.float32) * s
    w_hh_f = jax.random.normal(ks[4], (4 * HID, HID), jnp.float32) * s
    b_ih_f = jax.random.normal(ks[5], (4 * HID,), jnp.float32) * s
    b_hh_f = jax.random.normal(ks[6], (4 * HID,), jnp.float32) * s
    w_ih_b = jax.random.normal(ks[7], (4 * HID, CONV_OUT), jnp.float32) * s
    w_hh_b = jax.random.normal(ks[8], (4 * HID, HID), jnp.float32) * s
    b_ih_b = jax.random.normal(ks[9], (4 * HID,), jnp.float32) * s
    b_hh_b = jax.random.normal(ks[10], (4 * HID,), jnp.float32) * s
    w_fc = jax.random.normal(ks[11], (OUT, 2 * HID), jnp.float32) * s
    b_fc = jax.random.normal(ks[12], (OUT,), jnp.float32) * s
    return dict(embedding=embedding, w_conv=w_conv, b_conv=b_conv,
                w_ih_f=w_ih_f, w_hh_f=w_hh_f, b_ih_f=b_ih_f, b_hh_f=b_hh_f,
                w_ih_b=w_ih_b, w_hh_b=w_hh_b, b_ih_b=b_ih_b, b_hh_b=b_hh_b,
                w_fc=w_fc, b_fc=b_fc)


def pack_params(p):
    """One-time weight re-layout into two kernel slabs (constant folding, not per-call work)."""
    emb_pad = jnp.zeros((VOCAB_PAD, EMB), jnp.float32).at[:VOCAB].set(p["embedding"])
    # fused embedding x conv table: row (k*64 + v) = emb_pad[v] @ w_conv[:, :, k].T
    gtab = jnp.concatenate([emb_pad @ p["w_conv"][:, :, k].T for k in range(K)],
                           axis=0)                                          # (K*VOCAB_PAD, CONV_OUT)

    w_ih_cat = jnp.concatenate([p["w_ih_f"].T, p["w_ih_b"].T], axis=1)      # (32, 256)
    w_hh_f = p["w_hh_f"].T                                                  # (32, 128)
    w_fc_pad = jnp.zeros((2 * HID, LANES), jnp.float32).at[:, :OUT].set(p["w_fc"].T)
    bias = jnp.zeros((8, LANES), jnp.float32)
    bias = bias.at[0, :4 * HID].set(p["b_ih_f"] + p["b_hh_f"])
    bias = bias.at[1, :4 * HID].set(p["b_ih_b"] + p["b_hh_b"])
    bias = bias.at[2, :OUT].set(p["b_fc"])
    bias = bias.at[3, :CONV_OUT].set(p["b_conv"])

    wslab = jnp.zeros((136, 256), jnp.float32)
    wslab = wslab.at[0:32, :].set(w_ih_cat)
    wslab = wslab.at[32:64, 0:LANES].set(w_hh_f)
    wslab = wslab.at[64:128, 0:LANES].set(w_fc_pad)
    wslab = wslab.at[128:136, 0:LANES].set(bias)
    return dict(gtab=gtab, wslab=wslab)


def reference_forward(tokens, p):
    """Pure-JAX reference mirroring the full PyTorch pipeline (incl. full reverse LSTM)."""
    emb = jnp.take(p["embedding"], tokens, axis=0)                          # (B, L, E)
    xpad = jnp.pad(emb, ((0, 0), (1, 1), (0, 0)))
    conv = sum(jnp.einsum('ble,oe->blo', xpad[:, k:k + L, :], p["w_conv"][:, :, k])
               for k in range(K)) + p["b_conv"][None, None, :]
    pooled = jnp.maximum(conv[:, 0::2, :], conv[:, 1::2, :])                # (B, T, 32)

    def run(xs, w_ih, w_hh, b_ih, b_hh):
        h = jnp.zeros((B, HID)); c = jnp.zeros((B, HID)); hs = []
        for t in range(xs.shape[1]):
            g = xs[:, t] @ w_ih.T + h @ w_hh.T + b_ih + b_hh
            i = jax.nn.sigmoid(g[:, :HID]); f = jax.nn.sigmoid(g[:, HID:2 * HID])
            gg = jnp.tanh(g[:, 2 * HID:3 * HID]); o = jax.nn.sigmoid(g[:, 3 * HID:])
            c = f * c + i * gg; h = o * jnp.tanh(c); hs.append(h)
        return jnp.stack(hs, axis=1)

    out_f = run(pooled, p["w_ih_f"], p["w_hh_f"], p["b_ih_f"], p["b_hh_f"])
    out_b = run(pooled[:, ::-1], p["w_ih_b"], p["w_hh_b"], p["b_ih_b"], p["b_hh_b"])[:, ::-1]
    out = jnp.concatenate([out_f[:, -1], out_b[:, -1]], axis=-1)            # output[:, -1, :]
    return out @ p["w_fc"].T + p["b_fc"]                                    # dropout = identity (eval)


if __name__ == "__main__":
    key = jax.random.PRNGKey(0)
    k_tok, k_par = jax.random.split(key)
    tokens = jax.random.randint(k_tok, (B, L), 0, VOCAB, dtype=jnp.int32)
    params = init_params(k_par)
    packed = pack_params(params)   # one-time weight re-layout

    logits = jax.jit(lstm_sentiment_forward)(tokens, packed)
    jax.block_until_ready(logits)

    ref = reference_forward(tokens, params)
    assert logits.shape == (B, OUT)
    assert jnp.allclose(logits, ref, atol=1e-4, rtol=1e-4), (logits, ref)
    print("KERNEL_OK")
</pallas_src>

<mosaic_0001>
module attributes {stable_mosaic.version = 11 : i64} {
  func.func @lstm_sentiment_kernel(%arg0: memref<16x3xi32, #tpu.memory_space<vmem>>, %arg1: memref<192x32xf32, #tpu.memory_space<vmem>>, %arg2: memref<136x256xf32, #tpu.memory_space<vmem>>, %arg3: memref<2x128xf32, #tpu.memory_space<vmem>>) attributes {dimension_semantics = [], scalar_prefetch = 0 : i64, scratch_operands = 0 : i64, tpu.core_type = #tpu.core_type<tc>} {
    %c0 = arith.constant 0 : index
    %c0_0 = arith.constant 0 : index
    %0 = vector.load %arg2[%c0, %c0_0] : memref<136x256xf32, #tpu.memory_space<vmem>>, vector<32x256xf32>
    %c32 = arith.constant 32 : index
    %c0_1 = arith.constant 0 : index
    %1 = vector.load %arg2[%c32, %c0_1] : memref<136x256xf32, #tpu.memory_space<vmem>>, vector<32x128xf32>
    %c64 = arith.constant 64 : index
    %c0_2 = arith.constant 0 : index
    %2 = vector.load %arg2[%c64, %c0_2] : memref<136x256xf32, #tpu.memory_space<vmem>>, vector<64x128xf32>
    %c128 = arith.constant 128 : index
    %c0_3 = arith.constant 0 : index
    %3 = vector.load %arg2[%c128, %c0_3] : memref<136x256xf32, #tpu.memory_space<vmem>>, vector<8x128xf32>
    %4 = vector.extract_strided_slice %3 {offsets = [0, 0], sizes = [1, 128], strides = [1, 1]} : vector<8x128xf32> to vector<1x128xf32>
    %5 = vector.extract_strided_slice %3 {offsets = [1, 0], sizes = [1, 128], strides = [1, 1]} : vector<8x128xf32> to vector<1x128xf32>
    %6 = vector.extract_strided_slice %3 {offsets = [2, 0], sizes = [1, 128], strides = [1, 1]} : vector<8x128xf32> to vector<1x128xf32>
    %7 = vector.extract_strided_slice %3 {offsets = [3, 0], sizes = [1, 32], strides = [1, 1]} : vector<8x128xf32> to vector<1x32xf32>
    %c0_4 = arith.constant 0 : index
    %c0_5 = arith.constant 0 : index
    %8 = vector.load %arg0[%c0_4, %c0_5] : memref<16x3xi32, #tpu.memory_space<vmem>>, vector<16x3xi32>
    %9 = tpu.iota {dimensions = array<i32: 1>} : vector<16x192xi32>
    %10 = vector.extract_strided_slice %8 {offsets = [0, 0], sizes = [16, 1], strides = [1, 1]} : vector<16x3xi32> to vector<16x1xi32>
    %11 = vector.broadcast %10 : vector<16x1xi32> to vector<16x192xi32>
    %12 = arith.cmpi eq, %9, %11 : vector<16x192xi32>
    %13 = vector.extract_strided_slice %8 {offsets = [0, 1], sizes = [16, 1], strides = [1, 1]} : vector<16x3xi32> to vector<16x1xi32>
    %14 = vector.broadcast %13 : vector<16x1xi32> to vector<16x192xi32>
    %15 = arith.cmpi eq, %9, %14 : vector<16x192xi32>
    %16 = arith.ori %12, %15 : vector<16x192xi1>
    %17 = vector.extract_strided_slice %8 {offsets = [0, 2], sizes = [16, 1], strides = [1, 1]} : vector<16x3xi32> to vector<16x1xi32>
    %18 = vector.broadcast %17 : vector<16x1xi32> to vector<16x192xi32>
    %19 = arith.cmpi eq, %9, %18 : vector<16x192xi32>
    %20 = arith.ori %16, %19 : vector<16x192xi1>
    %21 = arith.extui %20 : vector<16x192xi1> to vector<16x192xi32>
    %22 = arith.sitofp %21 : vector<16x192xi32> to vector<16x192xf32>
    %c0_6 = arith.constant 0 : index
    %c0_7 = arith.constant 0 : index
    %23 = vector.load %arg1[%c0_6, %c0_7] : memref<192x32xf32, #tpu.memory_space<vmem>>, vector<192x32xf32>
    %cst = arith.constant dense<0.000000e+00> : vector<16x32xf32>
    %24 = tpu.matmul %22, %23, %cst {dimension_numbers = #tpu.dot_dimension_numbers<[1], [0], [0], [1], [0, 0, 1, 1], [], []>} : vector<16x192xf32>, vector<192x32xf32>, vector<16x32xf32> -> vector<16x32xf32>
    %25 = vector.broadcast %7 : vector<1x32xf32> to vector<16x32xf32>
    %26 = arith.addf %24, %25 : vector<16x32xf32>
    %27 = vector.extract_strided_slice %26 {offsets = [0, 0], sizes = [8, 32], strides = [1, 1]} : vector<16x32xf32> to vector<8x32xf32>
    %28 = vector.extract_strided_slice %26 {offsets = [8, 0], sizes = [8, 32], strides = [1, 1]} : vector<16x32xf32> to vector<8x32xf32>
    %29 = arith.maximumf %27, %28 : vector<8x32xf32>
    %cst_8 = arith.constant dense<0.000000e+00> : vector<8x256xf32>
    %30 = tpu.matmul %29, %0, %cst_8 {dimension_numbers = #tpu.dot_dimension_numbers<[1], [0], [0], [1], [0, 0, 1, 1], [], []>} : vector<8x32xf32>, vector<32x256xf32>, vector<8x256xf32> -> vector<8x256xf32>
    %31 = vector.extract_strided_slice %30 {offsets = [0, 0], sizes = [8, 128], strides = [1, 1]} : vector<8x256xf32> to vector<8x128xf32>
    %32 = vector.broadcast %4 : vector<1x128xf32> to vector<8x128xf32>
    %33 = arith.addf %31, %32 : vector<8x128xf32>
    %34 = vector.extract_strided_slice %30 {offsets = [6, 128], sizes = [2, 128], strides = [1, 1]} : vector<8x256xf32> to vector<2x128xf32>
    %35 = vector.broadcast %5 : vector<1x128xf32> to vector<2x128xf32>
    %36 = arith.addf %34, %35 : vector<2x128xf32>
    %37 = vector.extract_strided_slice %33 {offsets = [0, 0], sizes = [2, 128], strides = [1, 1]} : vector<8x128xf32> to vector<2x128xf32>
    %38 = arith.negf %37 : vector<2x128xf32>
    %39 = math.exp %38 : vector<2x128xf32>
    %cst_9 = arith.constant 1.000000e+00 : f32
    %40 = vector.broadcast %cst_9 : f32 to vector<2x128xf32>
    %41 = arith.addf %40, %39 : vector<2x128xf32>
    %42 = arith.divf %40, %41 : vector<2x128xf32>
    %43 = math.tanh %37 : vector<2x128xf32>
    %44 = vector.extract_strided_slice %42 {offsets = [0, 0], sizes = [2, 32], strides = [1, 1]} : vector<2x128xf32> to vector<2x32xf32>
    %45 = vector.extract_strided_slice %43 {offsets = [0, 64], sizes = [2, 32], strides = [1, 1]} : vector<2x128xf32> to vector<2x32xf32>
    %46 = vector.extract_strided_slice %42 {offsets = [0, 96], sizes = [2, 32], strides = [1, 1]} : vector<2x128xf32> to vector<2x32xf32>
    %47 = arith.mulf %44, %45 : vector<2x32xf32>
    %48 = math.tanh %47 : vector<2x32xf32>
    %49 = arith.mulf %46, %48 : vector<2x32xf32>
    %50 = vector.extract_strided_slice %33 {offsets = [2, 0], sizes = [2, 128], strides = [1, 1]} : vector<8x128xf32> to vector<2x128xf32>
    %cst_10 = arith.constant dense<0.000000e+00> : vector<2x128xf32>
    %51 = tpu.matmul %49, %1, %cst_10 {dimension_numbers = #tpu.dot_dimension_numbers<[1], [0], [0], [1], [0, 0, 1, 1], [], []>} : vector<2x32xf32>, vector<32x128xf32>, vector<2x128xf32> -> vector<2x128xf32>
    %52 = arith.addf %50, %51 : vector<2x128xf32>
    %53 = arith.negf %52 : vector<2x128xf32>
    %54 = math.exp %53 : vector<2x128xf32>
    %cst_11 = arith.constant 1.000000e+00 : f32
    %55 = vector.broadcast %cst_11 : f32 to vector<2x128xf32>
    %56 = arith.addf %55, %54 : vector<2x128xf32>
    %57 = arith.divf %55, %56 : vector<2x128xf32>
    %58 = math.tanh %52 : vector<2x128xf32>
    %59 = vector.extract_strided_slice %57 {offsets = [0, 0], sizes = [2, 32], strides = [1, 1]} : vector<2x128xf32> to vector<2x32xf32>
    %60 = vector.extract_strided_slice %57 {offsets = [0, 32], sizes = [2, 32], strides = [1, 1]} : vector<2x128xf32> to vector<2x32xf32>
    %61 = vector.extract_strided_slice %58 {offsets = [0, 64], sizes = [2, 32], strides = [1, 1]} : vector<2x128xf32> to vector<2x32xf32>
    %62 = vector.extract_strided_slice %57 {offsets = [0, 96], sizes = [2, 32], strides = [1, 1]} : vector<2x128xf32> to vector<2x32xf32>
    %63 = arith.mulf %60, %47 : vector<2x32xf32>
    %64 = arith.mulf %59, %61 : vector<2x32xf32>
    %65 = arith.addf %63, %64 : vector<2x32xf32>
    %66 = math.tanh %65 : vector<2x32xf32>
    %67 = arith.mulf %62, %66 : vector<2x32xf32>
    %68 = vector.extract_strided_slice %33 {offsets = [4, 0], sizes = [2, 128], strides = [1, 1]} : vector<8x128xf32> to vector<2x128xf32>
    %cst_12 = arith.constant dense<0.000000e+00> : vector<2x128xf32>
    %69 = tpu.matmul %67, %1, %cst_12 {dimension_numbers = #tpu.dot_dimension_numbers<[1], [0], [0], [1], [0, 0, 1, 1], [], []>} : vector<2x32xf32>, vector<32x128xf32>, vector<2x128xf32> -> vector<2x128xf32>
    %70 = arith.addf %68, %69 : vector<2x128xf32>
    %71 = arith.negf %70 : vector<2x128xf32>
    %72 = math.exp %71 : vector<2x128xf32>
    %cst_13 = arith.constant 1.000000e+00 : f32
    %73 = vector.broadcast %cst_13 : f32 to vector<2x128xf32>
    %74 = arith.addf %73, %72 : vector<2x128xf32>
    %75 = arith.divf %73, %74 : vector<2x128xf32>
    %76 = math.tanh %70 : vector<2x128xf32>
    %77 = vector.extract_strided_slice %75 {offsets = [0, 0], sizes = [2, 32], strides = [1, 1]} : vector<2x128xf32> to vector<2x32xf32>
    %78 = vector.extract_strided_slice %75 {offsets = [0, 32], sizes = [2, 32], strides = [1, 1]} : vector<2x128xf32> to vector<2x32xf32>
    %79 = vector.extract_strided_slice %76 {offsets = [0, 64], sizes = [2, 32], strides = [1, 1]} : vector<2x128xf32> to vector<2x32xf32>
    %80 = vector.extract_strided_slice %75 {offsets = [0, 96], sizes = [2, 32], strides = [1, 1]} : vector<2x128xf32> to vector<2x32xf32>
    %81 = arith.mulf %78, %65 : vector<2x32xf32>
    %82 = arith.mulf %77, %79 : vector<2x32xf32>
    %83 = arith.addf %81, %82 : vector<2x32xf32>
    %84 = math.tanh %83 : vector<2x32xf32>
    %85 = arith.mulf %80, %84 : vector<2x32xf32>
    %86 = vector.extract_strided_slice %33 {offsets = [6, 0], sizes = [2, 128], strides = [1, 1]} : vector<8x128xf32> to vector<2x128xf32>
    %cst_14 = arith.constant dense<0.000000e+00> : vector<2x128xf32>
    %87 = tpu.matmul %85, %1, %cst_14 {dimension_numbers = #tpu.dot_dimension_numbers<[1], [0], [0], [1], [0, 0, 1, 1], [], []>} : vector<2x32xf32>, vector<32x128xf32>, vector<2x128xf32> -> vector<2x128xf32>
    %88 = arith.addf %86, %87 : vector<2x128xf32>
    %89 = arith.negf %88 : vector<2x128xf32>
    %90 = math.exp %89 : vector<2x128xf32>
    %cst_15 = arith.constant 1.000000e+00 : f32
    %91 = vector.broadcast %cst_15 : f32 to vector<2x128xf32>
    %92 = arith.addf %91, %90 : vector<2x128xf32>
    %93 = arith.divf %91, %92 : vector<2x128xf32>
    %94 = math.tanh %88 : vector<2x128xf32>
    %95 = vector.extract_strided_slice %93 {offsets = [0, 0], sizes = [2, 32], strides = [1, 1]} : vector<2x128xf32> to vector<2x32xf32>
    %96 = vector.extract_strided_slice %93 {offsets = [0, 32], sizes = [2, 32], strides = [1, 1]} : vector<2x128xf32> to vector<2x32xf32>
    %97 = vector.extract_strided_slice %94 {offsets = [0, 64], sizes = [2, 32], strides = [1, 1]} : vector<2x128xf32> to vector<2x32xf32>
    %98 = vector.extract_strided_slice %93 {offsets = [0, 96], sizes = [2, 32], strides = [1, 1]} : vector<2x128xf32> to vector<2x32xf32>
    %99 = arith.mulf %96, %83 : vector<2x32xf32>
    %100 = arith.mulf %95, %97 : vector<2x32xf32>
    %101 = arith.addf %99, %100 : vector<2x32xf32>
    %102 = math.tanh %101 : vector<2x32xf32>
    %103 = arith.mulf %98, %102 : vector<2x32xf32>
    %104 = arith.negf %36 : vector<2x128xf32>
    %105 = math.exp %104 : vector<2x128xf32>
    %cst_16 = arith.constant 1.000000e+00 : f32
    %106 = vector.broadcast %cst_16 : f32 to vector<2x128xf32>
    %107 = arith.addf %106, %105 : vector<2x128xf32>
    %108 = arith.divf %106, %107 : vector<2x128xf32>
    %109 = math.tanh %36 : vector<2x128xf32>
    %110 = vector.extract_strided_slice %108 {offsets = [0, 0], sizes = [2, 32], strides = [1, 1]} : vector<2x128xf32> to vector<2x32xf32>
    %111 = vector.extract_strided_slice %109 {offsets = [0, 64], sizes = [2, 32], strides = [1, 1]} : vector<2x128xf32> to vector<2x32xf32>
    %112 = vector.extract_strided_slice %108 {offsets = [0, 96], sizes = [2, 32], strides = [1, 1]} : vector<2x128xf32> to vector<2x32xf32>
    %113 = arith.mulf %110, %111 : vector<2x32xf32>
    %114 = math.tanh %113 : vector<2x32xf32>
    %115 = arith.mulf %112, %114 : vector<2x32xf32>
    %116 = tpu.concatenate %103, %115 in 1 : vector<2x32xf32>, vector<2x32xf32> -> vector<2x64xf32>
    %cst_17 = arith.constant dense<0.000000e+00> : vector<2x128xf32>
    %117 = tpu.matmul %116, %2, %cst_17 {dimension_numbers = #tpu.dot_dimension_numbers<[1], [0], [0], [1], [0, 0, 1, 1], [], []>} : vector<2x64xf32>, vector<64x128xf32>, vector<2x128xf32> -> vector<2x128xf32>
    %118 = vector.broadcast %6 : vector<1x128xf32> to vector<2x128xf32>
    %119 = arith.addf %117, %118 : vector<2x128xf32>
    %c0_18 = arith.constant 0 : index
    %c0_19 = arith.constant 0 : index
    %120 = vector.load %arg3[%c0_18, %c0_19] : memref<2x128xf32, #tpu.memory_space<vmem>>, vector<2x128xf32>
    tpu.vector_store %arg3[%c0_18, %c0_19], %119 {strides = array<i32>} : memref<2x128xf32, #tpu.memory_space<vmem>>, vector<2x128xf32>,
    return
  }
}

</mosaic_0001>

<bundles_post_ra>
// kernel: lstm_sentiment_forward.1
= control target key start
LH: loop header
LB: loop body
LE: loop exit
PB: predicated region body
PF: predicated region fallthrough
CT: control target
= control target key end

     0   :  { %v639_v2 = vmov 2   ;;  %v640_v3 = vmov 0   ;;  %v641_v6 = vmov 1   ;;  %s857_s0 = inlined_call_operand.vmem [shape: s32[16,3], index: 0, kind: input, shape index: {}]   ;;  %s858_s1 = inlined_call_operand.vmem [shape: f32[192,32], index: 1, kind: input, shape index: {}]   ;;  %s859_s2 = inlined_call_operand.vmem [shape: f32[136,256], index: 2, kind: input, shape index: {}]   ;;  %s860_s3 = inlined_call_operand.hbm [shape: f32[2,128], index: 3, kind: output, shape index: {}]  }
   0x1   :  { %v36_v0 = vld [vmem:[%s857_s0] sm:$0xff]  ;;  %v102_v1 = vld [vmem:[%s858_s1 + $0x78] sm:$0xff]  ;;  %568 = vset.pattern.permute.xlu1 %v639_v2  ;;  %566 = vset.pattern.permute.xlu0 %v640_v3  ;;  %v101_v4 = vld [vmem:[%s858_s1 + $0x70] sm:$0xff] }
   0x2   :  { %66 = vperm.xlu1 %568, %v36_v0   ;;  %42 = vperm.xlu0 %566, %v36_v0   ;;  %v37_v5 = vld [vmem:[%s857_s0 + $0x8] sm:$0xff]  ;;  %v110_v7 = vld [vmem:[%s858_s1 + $0xb8] sm:$0xff] }
   0x3   :  { %570 = vset.pattern.permute.xlu2 %v641_v6  ;;  %119 = vmatpush.msra.mxu0 %v102_v1  ;;  %v100_v8 = vld [vmem:[%s858_s1 + $0x68] sm:$0xff] }
   0x4   :  { %55 = vperm.xlu2 %570, %v37_v5   ;;  %150 = vmatpush.msra.mxu1 %v110_v7 }
   0x5   :  { %8 = vsyncpa [#allocation3], 0  ;;  %120 = vmatpush.msra.mxu0 %v101_v4  ;;  %v99_v9 = vld [vmem:[%s858_s1 + $0x60] sm:$0xff]  ;;  %v98_v10 = vld [vmem:[%s858_s1 + $0x58] sm:$0xff]  ;;  %v38_v29 = vlaneseq  ;;  %vm112_vm9 = vcmask 523264   ;;  %v642_v38 = vmov 1.0  }
   0x6   :  { %v97_v11 = vld [vmem:[%s858_s1 + $0x50] sm:$0xff]  ;;  %v96_v12 = vld [vmem:[%s858_s1 + $0x48] sm:$0xff]  ;;  %v95_v13 = vld [vmem:[%s858_s1 + $0x40] sm:$0xff]  ;;  %v643_v39 = vmov 0.0   ;;  %s644_s25 = smov 64   ;;  %s645_s0 = smov 96  }
   0x7   :  { %121 = vmatpush.msra.mxu0 %v100_v8  ;;  %v94_v14 = vld [vmem:[%s858_s1 + $0x38] sm:$0xff]  ;;  %v93_v15 = vld [vmem:[%s858_s1 + $0x30] sm:$0xff]  ;;  %v92_v17 = vld [vmem:[%s858_s1 + $0x28] sm:$0xff]  ;;  %v39_v32 = vand.u32 127, %v38_v29  ;;  %s646_s26 = smov 32   ;;  %s647_s23 = smov [#allocation2]  }
   0x8   :  { %v109_v16 = vld [vmem:[%s858_s1 + $0xb0] sm:$0xff]  ;;  %v108_v18 = vld [vmem:[%s858_s1 + $0xa8] sm:$0xff]  ;;  %v91_v19 = vld [vmem:[%s858_s1 + $0x20] sm:$0xff]  ;;  %s527_s24 = sshll.u32 %s647_s23, 4  ;;  %s528_s24 = int_to_ptr.vmem [resolvable:$true] %s527_s24 }
   0x9   :  { %122 = vmatpush.msra.mxu0 %v99_v9  ;;  %151 = vmatpush.msra.mxu1 %v109_v16  ;;  %v107_v20 = vld [vmem:[%s858_s1 + $0xa0] sm:$0xff]  ;;  %v90_v21 = vld [vmem:[%s858_s1 + $0x18] sm:$0xff]  ;;  %v89_v23 = vld [vmem:[%s858_s1 + $0x10] sm:$0xff]  ;;  %v40_v34 = vadd.s32 128, %v39_v32 }
   0xa   :  { %569 = vset.pattern.permute.xlu1 %v640_v3  ;;  %567 = vset.pattern.permute.xlu0 %v641_v6  ;;  %v106_v22 = vld [vmem:[%s858_s1 + $0x98] sm:$0xff]  ;;  %v105_v24 = vld [vmem:[%s858_s1 + $0x90] sm:$0xff]  ;;  %v88_v25 = vld [vmem:[%s858_s1 + $0x8] sm:$0xff] }
   0xb   :  { %45 = vperm.xlu1 %569, %v37_v5   ;;  %52 = vperm.xlu0 %567, %v36_v0   ;;  %v104_v26 = vld [vmem:[%s858_s1 + $0x88] sm:$0xff]  ;;  %v87_v27 = vld [vmem:[%s858_s1] sm:$0xff]  ;;  %v21_v42 = vld [vmem:[%s859_s2 + $0x30] sm:$0xff] }
   0xc   :  { %571 = vset.pattern.permute.xlu2 %v639_v2  ;;  %123 = vmatpush.msra.mxu0 %v98_v10  ;;  %v103_v28 = vld [vmem:[%s858_s1 + $0x80] sm:$0xff]  ;;  %v22_v43 = vld [vmem:[%s859_s2 + $0x38] sm:$0xff]  ;;  %v20_v45 = vld [vmem:[%s859_s2 + $0x28] sm:$0xff] }
   0xd   :  { %69 = vperm.xlu2 %571, %v37_v5   ;;  %152 = vmatpush.msra.mxu1 %v108_v18  ;;  %v19_v44 = vld [vmem:[%s859_s2 + $0x20] sm:$0xff]  ;;  %v17_v46 = vld [vmem:[%s859_s2 + $0x10] sm:$0xff]  ;;  %v18_v47 = vld [vmem:[%s859_s2 + $0x18] sm:$0xff] }
   0xe   :  { %124 = vmatpush.msra.mxu0 %v97_v11  ;;  %182 = vmatpush.msra.mxu2 %v21_v42  ;;  %v15_v48 = vld [vmem:[%s859_s2] sm:$0xff]  ;;  %v16_v49 = vld [vmem:[%s859_s2 + $0x8] sm:$0xff]  ;;  %v26_v18 = vld [vmem:[%s859_s2 + $0x70] sm:$0xff] }
   0xf   :  { %153 = vmatpush.msra.mxu1 %v107_v20  ;;  %202 = vmatpush.msra.mxu3 %v22_v43  ;;  %v775_v50 = vld [vmem:[%s859_s2 + $0x100] sm:$0xff]  ;;  %v24_v20 = vld [vmem:[%s859_s2 + $0x50] sm:$0xff] }
  0x10   :  { %125 = vmatpush.msra.mxu0 %v96_v12  ;;  %183 = vmatpush.msra.mxu2 %v19_v44  ;;  %v111_v53 = vperm.slane %v775_v50, 3  ;;  %v210_v61 = vperm.slane %v775_v50, 0 }
  0x11   :  { %154 = vmatpush.msra.mxu1 %v106_v22  ;;  %203 = vmatpush.msra.mxu3 %v20_v45 }
  0x12   :  { %126 = vmatpush.msra.mxu0 %v95_v13  ;;  %184 = vmatpush.msra.mxu2 %v17_v46 }
  0x13   :  { %572 = vset.pattern.permute.xlu0 %v639_v2  ;;  %155 = vmatpush.msra.mxu1 %v105_v24 }
  0x14   :  { %127 = vmatpush.msra.mxu0 %v94_v14  ;;  %204 = vmatpush.msra.mxu3 %v18_v47 }
  0x15   :  { %156 = vmatpush.msra.mxu1 %v104_v26  ;;  %185 = vmatpush.msra.mxu2 %v15_v48 }
  0x16   :  { %128 = vmatpush.msra.mxu0 %v93_v15  ;;  %205 = vmatpush.msra.mxu3 %v16_v49 }
  0x17   :  { %157 = vmatpush.msra.mxu1 %v103_v28  ;;  %262 = vmatpush.msrb.mxu2 %v26_v18 }
  0x18   :  { %129 = vmatpush.msra.mxu0 %v92_v17  ;;  %334 = vmatpush.msrb.mxu3 %v26_v18 }
  0x1a   :  { %130 = vmatpush.msra.mxu0 %v91_v19  ;;  %v25_v19 = vld [vmem:[%s859_s2 + $0x60] sm:$0xff] }
  0x1b   :  { %263 = vmatpush.msrb.mxu2 %v25_v19  ;;  %335 = vmatpush.msrb.mxu3 %v25_v19 }
  0x1c   :  { %131 = vmatpush.msra.mxu0 %v90_v21  ;;  %v23_v21 = vld [vmem:[%s859_s2 + $0x40] sm:$0xff] }
  0x1d   :  { %264 = vmatpush.msrb.mxu2 %v24_v20  ;;  %336 = vmatpush.msrb.mxu3 %v24_v20 }
  0x1e   :  { %132 = vmatpush.msra.mxu0 %v89_v23 }
  0x1f   :  { %265 = vmatpush.msrb.mxu2 %v23_v21  ;;  %337 = vmatpush.msrb.mxu3 %v23_v21 }
  0x20   :  { %133 = vmatpush.msra.mxu0 %v88_v25 }
  0x22   :  { %134 = vmatpush.msra.mxu0 %v87_v27 }
  0x5e   :  { %v56_v33 = vpop.permute.xlu2 %55 }
  0x5f   :  { %vm60_vm10 = vcmp.eq.s32.totalorder %v40_v34, %v56_v33  ;;  %vm59_vm13 = vcmp.eq.s32.totalorder %v39_v32, %v56_v33 }
  0x67   :  { %v70_v37 = vpop.permute.xlu2 %69 }
  0x74   :  { %v43_v30 = vpop.permute.xlu0 %42  ;;  %v67_v31 = vpop.permute.xlu1 %66 }
  0x75   :  { %vm48_vm2 = vcmp.eq.s32.totalorder %v40_v34, %v43_v30  ;;  %vm47_vm3 = vcmp.eq.s32.totalorder %v39_v32, %v43_v30  ;;  %vm71_vm5 = vcmp.eq.s32.totalorder %v39_v32, %v67_v31  ;;  %vm72_vm7 = vcmp.eq.s32.totalorder %v40_v34, %v67_v31 }
  0x7d   :  { %v53_v35 = vpop.permute.xlu0 %52  ;;  %v46_v36 = vpop.permute.xlu1 %45 }
  0x7e   :  { %vm57_vm0 = vcmp.eq.s32.totalorder %v39_v32, %v53_v35  ;;  %vm58_vm1 = vcmp.eq.s32.totalorder %v40_v34, %v53_v35  ;;  %vm50_vm11 = vcmp.eq.s32.totalorder %v40_v34, %v46_v36  ;;  %vm49_vm14 = vcmp.eq.s32.totalorder %v39_v32, %v46_v36 }
  0x7f   :  { %vm62_vm4 = vmor %vm48_vm2, %vm58_vm1  ;;  %vm74_vm1 = vcmp.eq.s32.totalorder %v40_v34, %v70_v37  ;;  %vm73_vm2 = vcmp.eq.s32.totalorder %v39_v32, %v70_v37 }
  0x80   :  { %vm61_vm6 = vmor %vm47_vm3, %vm57_vm0 }
  0x81   :  { %vm75_vm8 = vmor %vm61_vm6, %vm71_vm5 }
  0x82   :  { %542 = vmatmul.msk.f32.vlgmr.msra.gmra.mxu0 %vm75_vm8, %v642_v38  ;;  %vm76_vm12 = vmor %vm62_vm4, %vm72_vm7  ;;  %vm166_vm4 = vcmask 261120  }
  0x83   :  { %v539_v40 = vsel %vm76_vm12, 1.0, %v643_v39  ;;  %vm64_vm15 = vmor %vm50_vm11, %vm60_vm10 }
  0x84   :  { %544 = vmatmul.msk.f32.vlgmr.msra.gmra.mxu1 %vm112_vm9, %v539_v40  ;;  %vm63_vm0 = vmor %vm49_vm14, %vm59_vm13 }
  0x85   :  { %vm78_vm3 = vmor %vm64_vm15, %vm74_vm1 }
  0x86   :  { %vm77_vm5 = vmor %vm63_vm0, %vm73_vm2  ;;  %v541_v41 = vsel %vm78_vm3, 1.0, %v643_v39 }
  0x8a   :  { %543 = vmatmul.msk.f32.gmra.mxu0 %vm77_vm5, %v642_v38 }
  0x8c   :  { %545 = vmatmul.msk.f32.gmra.mxu1 %vm112_vm9, %v541_v41 }
  0xff   :  { %v136_v51 = vpop.f32.mrf.mxu0 }
 0x100   :  { %v137_v54 = vadd.f32 %v136_v51, %v111_v53 }
 0x101   :  { %v159_v52 = vpop.f32.mrf.mxu1 }
 0x102   :  { %v160_v58 = vadd.f32 %v159_v52, %v137_v54 }
 0x107   :  { %v139_v55 = vpop.f32.mrf.mxu0 }
 0x108   :  { %v140_v56 = vadd.f32 %v139_v55, %v111_v53 }
 0x109   :  { %v162_v57 = vpop.f32.mrf.mxu1 }
 0x10a   :  { %v163_v59 = vadd.f32 %v162_v57, %v140_v56 }
 0x10c   :  { %v165_v60 = vmax.f32 %v160_v58, %v163_v59 }
 0x10e   :  { %546 = vmatmul.msk.f32.vlgmr.msra.gmra.mxu2 %vm166_vm4, %v165_v60  ;;  %547 = vmatmul.msk.f32.vlgmr.msra.gmra.mxu3 %vm166_vm4, %v165_v60 }
 0x10f   :  { %404 = vmatpush.msra.mxu2 %v26_v18 }
 0x111   :  { %405 = vmatpush.msra.mxu2 %v25_v19 }
 0x113   :  { %406 = vmatpush.msra.mxu2 %v24_v20 }
 0x115   :  { %407 = vmatpush.msra.mxu2 %v23_v21 }
 0x191   :  { %v187_v62 = vpop.f32.mrf.mxu2  ;;  %v207_v54 = vpop.f32.mrf.mxu3 }
 0x192   :  { %v781_v63 = vadd.f32 %v210_v61, %v187_v62 }
 0x194   :  { %573 = vtanh.f32 %v781_v63  ;;  %v548_v1 = vmul.f32 -1.442695, %v781_v63 }
 0x196   :  { %575 = vpow2.f32 %v548_v1 }
 0x19a   :  { %v574_v0 = vpop.eup %573 }
 0x19b   :  { %235 = vrot.lane.b32.xlu1 %v574_v0, %s644_s25 }
 0x19c   :  { %v576_v2 = vpop.eup %575 }
 0x19d   :  { %v217_v3 = vadd.f32 1.0, %v576_v2 }
 0x19f   :  { %577 = vrcp.f32 %v217_v3  ;;  %v229_v9 = vand.u32 2147483648, %v217_v3  ;;  %vm223_vm7 = vweird.f32 %v217_v3  ;;  %v227_v10 = vand.u32 2147483647, %v217_v3 }
 0x1a1   :  { %v230_v12 = vor.u32 1.1754944e-38, %v229_v9  ;;  %vm228_vm10 = vcmp.eq.f32.partialorder %v227_v10, 8.507059e+37 }
 0x1a5   :  { %v578_v4 = vpop.eup %577 }
 0x1a6   :  { %v219_v5 = vmul.f32 %v578_v4, %v217_v3  ;;  %vm224_vm6 = vweird.f32 %v578_v4 }
 0x1a7   :  { %vm225_vm8 = vmor %vm223_vm7, %vm224_vm6 }
 0x1a8   :  { %v220_v6 = vsub.f32 1.0, %v219_v5 }
 0x1aa   :  { %v221_v7 = vmul.f32 %v578_v4, %v220_v6 }
 0x1ac   :  { %v222_v8 = vadd.f32 %v578_v4, %v221_v7 }
 0x1ae   :  { %v226_v11 = vsel %vm225_vm8, %v578_v4, %v222_v8 }
 0x1af   :  { %v231_v14 = vsel %vm228_vm10, %v230_v12, %v226_v11 }
 0x20d   :  { %v236_v13 = vpop.permute.xlu1 %235 }
 0x20e   :  { %v238_v15 = vmul.f32 %v236_v13, %v231_v14 }
 0x210   :  { %579 = vtanh.f32 %v238_v15  ;;  %v295_v17 = vrot.slane %v238_v15, 6 }
 0x216   :  { %v580_v16 = vpop.eup %579 }
 0x217   :  { %241 = vrot.lane.b32.xlu2 %v580_v16, %s645_s0  ;;  %v212_v16 = vperm.slane %v775_v50, 1 }
 0x219   :  { %v213_v19 = vadd.f32 %v212_v16, %v207_v54  ;;  %v496_v16 = vperm.slane %v775_v50, 2 }
 0x21f   :  { %296 = vrot.lane.b32.xlu2 %v295_v17, %s646_s26 }
 0x271   :  { %v242_v22 = vpop.permute.xlu2 %241 }
 0x272   :  { %v244_v23 = vmul.f32 %v242_v22, %v231_v14 }
 0x274   :  { %246 = vrot.lane.b32.xlu0 %v244_v23, %s646_s26 }
 0x279   :  { %v297_v44 = vpop.permute.xlu2 %296 }
 0x2e6   :  { %v247_v24 = vpop.permute.xlu0 %246 }
 0x2e7   :  { %549 = vmatmul.msk.f32.vlgmr.msrb.gmra.mxu2 %vm166_vm4, %v247_v24 }
 0x36a   :  { %v267_v25 = vpop.f32.mrf.mxu2 }
 0x36b   :  { %v271_v26 = vrot.slane %v267_v25, 6 }
 0x36d   :  { %v273_v27 = vadd.f32 %v271_v26, %v781_v63 }
 0x36f   :  { %581 = vtanh.f32 %v273_v27  ;;  %v550_v29 = vmul.f32 -1.442695, %v273_v27  ;;  %v555_v27 = vmul.f32 -1.442695, %v213_v19 }
 0x371   :  { %583 = vpow2.f32 %v550_v29 }
 0x375   :  { %v582_v28 = vpop.eup %581 }
 0x376   :  { %301 = vrot.lane.b32.xlu1 %v582_v28, %s644_s25 }
 0x377   :  { %v584_v30 = vpop.eup %583 }
 0x378   :  { %v277_v31 = vadd.f32 1.0, %v584_v30 }
 0x37a   :  { %585 = vrcp.f32 %v277_v31  ;;  %v289_v37 = vand.u32 2147483648, %v277_v31  ;;  %vm283_vm12 = vweird.f32 %v277_v31  ;;  %v287_v38 = vand.u32 2147483647, %v277_v31 }
 0x37c   :  { %v290_v40 = vor.u32 1.1754944e-38, %v289_v37  ;;  %vm288_vm14 = vcmp.eq.f32.partialorder %v287_v38, 8.507059e+37 }
 0x380   :  { %v586_v32 = vpop.eup %585 }
 0x381   :  { %v279_v33 = vmul.f32 %v586_v32, %v277_v31  ;;  %vm284_vm11 = vweird.f32 %v586_v32 }
 0x382   :  { %vm285_vm13 = vmor %vm283_vm12, %vm284_vm11 }
 0x383   :  { %v280_v34 = vsub.f32 1.0, %v279_v33 }
 0x385   :  { %v281_v35 = vmul.f32 %v586_v32, %v280_v34 }
 0x387   :  { %v282_v36 = vadd.f32 %v586_v32, %v281_v35 }
 0x389   :  { %v286_v39 = vsel %vm285_vm13, %v586_v32, %v282_v36 }
 0x38a   :  { %v291_v42 = vsel %vm288_vm14, %v290_v40, %v286_v39 }
 0x38b   :  { %v299_v45 = vmul.f32 %v297_v44, %v291_v42 }
 0x3e8   :  { %v302_v41 = vpop.permute.xlu1 %301 }
 0x3e9   :  { %v304_v43 = vmul.f32 %v302_v41, %v291_v42 }
 0x3eb   :  { %306 = vrot.lane.b32.xlu0 %v304_v43, %s646_s26 }
 0x45d   :  { %v307_v46 = vpop.permute.xlu0 %306 }
 0x45e   :  { %v309_v47 = vadd.f32 %v307_v46, %v299_v45 }
 0x460   :  { %587 = vtanh.f32 %v309_v47  ;;  %v367_v11 = vrot.slane %v309_v47, 6 }
 0x466   :  { %v588_v48 = vpop.eup %587 }
 0x467   :  { %312 = vrot.lane.b32.xlu1 %v588_v48, %s644_s25 }
 0x4d9   :  { %v313_v49 = vpop.permute.xlu1 %312 }
 0x4da   :  { %v315_v51 = vmul.f32 %v313_v49, %v291_v42 }
 0x4dc   :  { %v317_v52 = vrot.slane %v315_v51, 2 }
 0x4de   :  { %318 = vrot.lane.b32.xlu2 %v317_v52, %s646_s26 }
 0x538   :  { %v319_v53 = vpop.permute.xlu2 %318 }
 0x539   :  { %551 = vmatmul.msk.f32.vlgmr.msrb.gmra.mxu3 %vm166_vm4, %v319_v53 }
 0x5bc   :  { %v339_v55 = vpop.f32.mrf.mxu3 }
 0x5bd   :  { %v343_v56 = vrot.slane %v339_v55, 4 }
 0x5bf   :  { %v345_v57 = vadd.f32 %v343_v56, %v781_v63 }
 0x5c1   :  { %589 = vtanh.f32 %v345_v57  ;;  %v552_v59 = vmul.f32 -1.442695, %v345_v57 }
 0x5c3   :  { %591 = vpow2.f32 %v552_v59 }
 0x5c7   :  { %v590_v58 = vpop.eup %589 }
 0x5c8   :  { %371 = vrot.lane.b32.xlu0 %v590_v58, %s644_s25 }
 0x5c9   :  { %v592_v60 = vpop.eup %591 }
 0x5ca   :  { %v349_v61 = vadd.f32 1.0, %v592_v60 }
 0x5cc   :  { %593 = vrcp.f32 %v349_v61  ;;  %v361_v4 = vand.u32 2147483648, %v349_v61  ;;  %vm355_vm1 = vweird.f32 %v349_v61  ;;  %v359_v5 = vand.u32 2147483647, %v349_v61 }
 0x5ce   :  { %v362_v7 = vor.u32 1.1754944e-38, %v361_v4  ;;  %vm360_vm0 = vcmp.eq.f32.partialorder %v359_v5, 8.507059e+37  ;;  %v32_v4 = vld [vmem:[%s859_s2 + $0xd0] sm:$0xff]  ;;  %v31_v5 = vld [vmem:[%s859_s2 + $0xc0] sm:$0xff] }
 0x5d2   :  { %v594_v62 = vpop.eup %593 }
 0x5d3   :  { %v351_v0 = vmul.f32 %v594_v62, %v349_v61  ;;  %vm356_vm15 = vweird.f32 %v594_v62 }
 0x5d4   :  { %vm357_vm2 = vmor %vm355_vm1, %vm356_vm15 }
 0x5d5   :  { %v352_v1 = vsub.f32 1.0, %v351_v0 }
 0x5d7   :  { %v353_v2 = vmul.f32 %v594_v62, %v352_v1 }
 0x5d9   :  { %v354_v3 = vadd.f32 %v594_v62, %v353_v2  ;;  %v34_v2 = vld [vmem:[%s859_s2 + $0xf0] sm:$0xff] }
 0x5da   :  { %509 = vmatpush.msrb.mxu1 %v34_v2 }
 0x5db   :  { %v358_v6 = vsel %vm357_vm2, %v594_v62, %v354_v3  ;;  %v33_v3 = vld [vmem:[%s859_s2 + $0xe0] sm:$0xff] }
 0x5dc   :  { %v363_v9 = vsel %vm360_vm0, %v362_v7, %v358_v6  ;;  %510 = vmatpush.msrb.mxu1 %v33_v3  ;;  %v30_v6 = vld [vmem:[%s859_s2 + $0xb0] sm:$0xff]  ;;  %v29_v7 = vld [vmem:[%s859_s2 + $0xa0] sm:$0xff] }
 0x5dd   :  { %v369_v12 = vmul.f32 %v367_v11, %v363_v9  ;;  %v27_v11 = vld [vmem:[%s859_s2 + $0x80] sm:$0xff] }
 0x5de   :  { %511 = vmatpush.msrb.mxu1 %v32_v4 }
 0x5e0   :  { %512 = vmatpush.msrb.mxu1 %v31_v5 }
 0x5e2   :  { %513 = vmatpush.msrb.mxu1 %v30_v6 }
 0x5e4   :  { %514 = vmatpush.msrb.mxu1 %v29_v7 }
 0x63a   :  { %v372_v8 = vpop.permute.xlu0 %371 }
 0x63b   :  { %v374_v10 = vmul.f32 %v372_v8, %v363_v9  ;;  %v28_v8 = vld [vmem:[%s859_s2 + $0x90] sm:$0xff] }
 0x63c   :  { %515 = vmatpush.msrb.mxu1 %v28_v8 }
 0x63d   :  { %376 = vrot.lane.b32.xlu1 %v374_v10, %s646_s26 }
 0x63e   :  { %516 = vmatpush.msrb.mxu1 %v27_v11 }
 0x6af   :  { %v377_v13 = vpop.permute.xlu1 %376 }
 0x6b0   :  { %v811_v14 = vadd.f32 %v377_v13, %v369_v12 }
 0x6b2   :  { %595 = vtanh.f32 %v811_v14  ;;  %v437_v58 = vrot.slane %v811_v14, 6 }
 0x6b3   :  { %597 = vtanh.f32 %v213_v19 }
 0x6b8   :  { %v596_v15 = vpop.eup %595 }
 0x6b9   :  { %382 = vrot.lane.b32.xlu2 %v596_v15, %s644_s25  ;;  %v598_v21 = vpop.eup %597 }
 0x713   :  { %v383_v17 = vpop.permute.xlu2 %382 }
 0x714   :  { %v385_v18 = vmul.f32 %v383_v17, %v363_v9 }
 0x716   :  { %v387_v20 = vrot.slane %v385_v18, 4 }
 0x718   :  { %388 = vrot.lane.b32.xlu0 %v387_v20, %s646_s26 }
 0x720   :  { %477 = vrot.lane.b32.xlu0 %v598_v21, %s644_s25 }
 0x78a   :  { %v389_v22 = vpop.permute.xlu0 %388 }
 0x78b   :  { %553 = vmatmul.msk.f32.vlgmr.msra.gmra.mxu2 %vm166_vm4, %v389_v22 }
 0x792   :  { %v478_v48 = vpop.permute.xlu0 %477 }
 0x80e   :  { %v409_v23 = vpop.f32.mrf.mxu2 }
 0x80f   :  { %v413_v24 = vrot.slane %v409_v23, 2 }
 0x811   :  { %v415_v25 = vadd.f32 %v413_v24, %v781_v63 }
 0x813   :  { %599 = vtanh.f32 %v415_v25  ;;  %v554_v28 = vmul.f32 -1.442695, %v415_v25 }
 0x814   :  { %601 = vpow2.f32 %v555_v27 }
 0x815   :  { %603 = vpow2.f32 %v554_v28 }
 0x819   :  { %v600_v26 = vpop.eup %599 }
 0x81a   :  { %441 = vrot.lane.b32.xlu1 %v600_v26, %s644_s25  ;;  %v602_v29 = vpop.eup %601 }
 0x81b   :  { %v604_v30 = vpop.eup %603  ;;  %v459_v31 = vadd.f32 1.0, %v602_v29 }
 0x81c   :  { %v419_v32 = vadd.f32 1.0, %v604_v30 }
 0x81d   :  { %605 = vrcp.f32 %v459_v31  ;;  %v471_v41 = vand.u32 2147483648, %v459_v31  ;;  %vm465_vm6 = vweird.f32 %v459_v31  ;;  %v469_v43 = vand.u32 2147483647, %v459_v31 }
 0x81e   :  { %607 = vrcp.f32 %v419_v32  ;;  %v431_v44 = vand.u32 2147483648, %v419_v32  ;;  %vm425_vm8 = vweird.f32 %v419_v32  ;;  %v429_v45 = vand.u32 2147483647, %v419_v32 }
 0x81f   :  { %v472_v47 = vor.u32 1.1754944e-38, %v471_v41  ;;  %vm470_vm11 = vcmp.eq.f32.partialorder %v469_v43, 8.507059e+37 }
 0x820   :  { %v432_v51 = vor.u32 1.1754944e-38, %v431_v44  ;;  %vm430_vm12 = vcmp.eq.f32.partialorder %v429_v45, 8.507059e+37 }
 0x823   :  { %v606_v33 = vpop.eup %605 }
 0x824   :  { %v608_v34 = vpop.eup %607  ;;  %v461_v35 = vmul.f32 %v606_v33, %v459_v31  ;;  %vm466_vm3 = vweird.f32 %v606_v33 }
 0x825   :  { %v421_v36 = vmul.f32 %v608_v34, %v419_v32  ;;  %vm426_vm5 = vweird.f32 %v608_v34  ;;  %vm467_vm7 = vmor %vm465_vm6, %vm466_vm3 }
 0x826   :  { %v462_v37 = vsub.f32 1.0, %v461_v35  ;;  %vm427_vm10 = vmor %vm425_vm8, %vm426_vm5 }
 0x827   :  { %v422_v63 = vsub.f32 1.0, %v421_v36 }
 0x828   :  { %v463_v38 = vmul.f32 %v606_v33, %v462_v37 }
 0x829   :  { %v423_v39 = vmul.f32 %v608_v34, %v422_v63 }
 0x82a   :  { %v464_v40 = vadd.f32 %v606_v33, %v463_v38 }
 0x82b   :  { %v424_v42 = vadd.f32 %v608_v34, %v423_v39 }
 0x82c   :  { %v468_v46 = vsel %vm467_vm7, %v606_v33, %v464_v40 }
 0x82d   :  { %v428_v49 = vsel %vm427_vm10, %v608_v34, %v424_v42  ;;  %v473_v52 = vsel %vm470_vm11, %v472_v47, %v468_v46 }
 0x82e   :  { %v480_v53 = vmul.f32 %v478_v48, %v473_v52  ;;  %v433_v55 = vsel %vm430_vm12, %v432_v51, %v428_v49 }
 0x82f   :  { %v439_v59 = vmul.f32 %v437_v58, %v433_v55 }
 0x830   :  { %609 = vtanh.f32 %v480_v53 }
 0x836   :  { %v610_v57 = vpop.eup %609 }
 0x88c   :  { %v442_v54 = vpop.permute.xlu1 %441 }
 0x88d   :  { %v444_v56 = vmul.f32 %v442_v54, %v433_v55 }
 0x88f   :  { %446 = vrot.lane.b32.xlu2 %v444_v56, %s646_s26 }
 0x897   :  { %483 = vrot.lane.b32.xlu2 %v610_v57, %s645_s0 }
 0x8e9   :  { %v447_v60 = vpop.permute.xlu2 %446 }
 0x8ea   :  { %v449_v61 = vadd.f32 %v447_v60, %v439_v59 }
 0x8ec   :  { %611 = vtanh.f32 %v449_v61 }
 0x8f1   :  { %v484_v0 = vpop.permute.xlu2 %483 }
 0x8f2   :  { %v612_v62 = vpop.eup %611  ;;  %v486_v1 = vmul.f32 %v484_v0, %v473_v52 }
 0x8f3   :  { %452 = vrot.lane.b32.xlu1 %v612_v62, %s644_s25 }
 0x8fb   :  { %492 = vrot.lane.b32.xlu1 %v486_v1, %s644_s25 }
 0x965   :  { %v453_v9 = vpop.permute.xlu1 %452 }
 0x966   :  { %v455_v10 = vmul.f32 %v453_v9, %v433_v55 }
 0x968   :  { %488 = vrot.lane.b32.xlu0 %v455_v10, %s646_s26  ;;  %s529_s26 = sshll.u32 %s860_s3, 4  ;;  %s530_s26 = int_to_ptr.hbm [resolvable:$true] %s529_s26 }
 0x96d   :  { %v493_v12 = vpop.permute.xlu1 %492 }
 0x9da   :  { %v489_v13 = vpop.permute.xlu0 %488 }
 0x9db   :  { %v495_v14 = vsel %vm166_vm4, %v489_v13, %v493_v12 }
 0x9dc   :  { %v498_v15 = vrot.slane %v495_v14, 6 }
 0x9de   :  { %556 = vmatmul.msk.f32.vlgmr.msrb.gmra.mxu1 %vm112_vm9, %v498_v15 }
 0xa5b   :  { %v518_v17 = vpop.f32.mrf.mxu1 }
 0xa5c   :  { %v519_v18 = vadd.f32 %v518_v17, %v496_v16 }
 0xa5e   :  { %521 = vst [vmem:[#allocation2] sm:$0x3] %v519_v18 }
 0xa5f   :  { %532 = dma.vmem_to_hbm [thread:$0]  %s528_s24, 32, %s530_s26, [#allocation3]  }
 0xa60   :  { %637 = dma.done.wait [#allocation3], 32  }
 0xa61   :  { %638 = vsyncadd [#allocation3], 4294967264 }
 0xa62   :  { %537 = vsyncpa [#allocation3], 1 }

</bundles_post_ra>
